<compile_context>
chip_gen: v7x
topology: tpu7x:2x2x1
jax: 0.10.0
libtpu: 0.0.40
codegen_flags: <defaults>
</compile_context>

<pallas_src>
import functools

import jax
import jax.numpy as jnp
from jax import lax
from jax.experimental import pallas as pl
from jax.experimental.pallas import tpu as pltpu

NEG_SLOPE = 0.01   # nn.LeakyReLU() default
BN_EPS = 1e-5      # nn.BatchNorm2d default

_VMEM_BUDGET = 44 * 1024 * 1024   # conservative: fits v7x's 64 MiB physical VMEM


def _rup(x, m):
    return ((x + m - 1) // m) * m


def _vmem_bytes(Hq, Wq, C, TM):
    """Rough per-step VMEM footprint of kernel 1 (lane/sublane padded)."""
    c_l = _rup(C, 128)
    planes = 2 * 4 * Hq * _rup(Wq, 8) * c_l * 2        # 4 bf16 planes, double-buffered
    w = 2 * _rup(C, 8) * _rup(9 * C, 128) * 2          # bf16 (C, 9C) weights
    y = 2 * _rup(C, 8) * _rup(TM, 128) * 2             # bf16 conv tile output
    stats = 2 * 8 * 128 * 4                            # (2, C) f32 partials
    patch = _rup(TM, 8) * _rup(9 * C, 128) * 2         # in-kernel im2col slab (bf16)
    acc = _rup(C, 8) * _rup(TM, 128) * 4               # f32 MXU accumulator
    return planes + w + y + stats + patch + acc


def _pick_row_tile(Ho, Wo, C, Hq, Wq, budget=_VMEM_BUDGET):
    """Largest output-row tile TR dividing Ho whose stores are lane-dense
    (TR*Wo % 128 == 0, or the full spatial extent) and whose per-step working set
    (including the resident parity-plane blocks) fits the VMEM budget."""
    cands = [tr for tr in range(Ho, 0, -1)
             if Ho % tr == 0 and ((tr * Wo) % 128 == 0 or tr == Ho)]
    for tr in cands:                       # largest first
        if _vmem_bytes(Hq, Wq, C, tr * Wo) <= budget:
            return tr
    return cands[-1]                       # smallest aligned tile; rely on vmem_limit


def conv_stats_kernel(p00_ref, p01_ref, p10_ref, p11_ref, w_ref,
                      y_ref, stats_ref, *, Wo, TR, C):
    """3x3 stride-2 conv (single K=9C MXU matmul) + per-block BN partial stats.

    p??_ref : (Hq, Wq, C) bf16 -- the 4 stride-2 parity planes of the reflect-padded
                                  image (row parity, col parity); resident across
                                  the row-tile grid axis (index map depends on n only).
    w_ref   : (C, 9C)     bf16 -- w[co, (3*dy+dx)*C + ci] = conv_w[dy, dx, ci, co]
    y_ref   : (C, TR*Wo)  bf16 -- channel-major conv output tile (lane-dense spatial)
    stats_ref : (2, C)    f32  -- row 0: partial sum, row 1: partial sum of squares
    """
    planes = (p00_ref, p01_ref, p10_ref, p11_ref)
    TM = TR * Wo
    r0 = pl.multiple_of(pl.program_id(1) * TR, TR)

    # In-kernel im2col over the tile: one (TM, 9C) patch slab.
    taps = []
    for dy in range(3):
        for dx in range(3):
            pref = planes[2 * (dy % 2) + (dx % 2)]      # which parity plane
            oy, ox = dy // 2, dx // 2                   # shift inside the plane
            tap = pref[pl.ds(r0 + oy, TR), pl.ds(ox, Wo), :]   # (TR, Wo, C) bf16
            taps.append(tap.reshape(TM, C))
    patch = jnp.concatenate(taps, axis=-1)              # (TM, 9C) bf16

    # (Cout, 9Cin) x (TM, 9Cin) contracted over 9Cin -> (Cout, TM): single K=9C
    # MXU matmul; result lands channel-major (no transpose downstream).
    acc = lax.dot_general(
        w_ref[...], patch,
        dimension_numbers=(((1,), (1,)), ((), ())),
        preferred_element_type=jnp.float32)

    y_ref[...] = acc.astype(y_ref.dtype)

    # Per-block BN partial statistics, lane-dense (2, C).
    # TODO(synk): E[x^2]-E[x]^2 in f32 can cancel for large activation means;
    # switch to per-block centered partials if tighter BN accuracy is required.
    s = jnp.sum(acc, axis=1, keepdims=True)             # (C, 1)
    sq = jnp.sum(acc * acc, axis=1, keepdims=True)      # (C, 1)
    stats_ref[...] = jnp.concatenate([s, sq], axis=1).T  # (2, C)


def bn_act_kernel(y_ref, scale_ref, shift_ref, o_ref):
    """BatchNorm affine (precomputed per-channel scale/shift) + LeakyReLU(0.01)."""
    z = y_ref[...].astype(jnp.float32) * scale_ref[...] + shift_ref[...]
    o_ref[...] = jnp.where(z >= 0, z, NEG_SLOPE * z)


@jax.jit
def down_forward(x_nchw, w_hwio, gamma, beta):
    N, C, H, W = x_nchw.shape
    assert H % 2 == 0 and W % 2 == 0, "stride-2 parity split assumes even H, W"
    Ho, Wo = H // 2, W // 2            # == floor((H+2-3)/2)+1 for even H
    Hq, Wq = Ho + 1, Wo + 1            # parity-plane spatial extents

    TR = _pick_row_tile(Ho, Wo, C, Hq, Wq)
    n_rt = Ho // TR
    TM = TR * Wo
    vmem_limit = int(min(max(int(1.25 * _vmem_bytes(Hq, Wq, C, TM)) + (4 << 20),
                             32 << 20), 56 << 20))

    # ---- glue (pure layout): NHWC, reflect pad, bf16, 4 stride-2 parity planes ----
    # TODO(synk): for C << 128 the channel-on-lanes layout wastes lanes; production
    # sizes should use C >= 128 or a width-on-lanes restructuring.
    x = jnp.transpose(x_nchw, (0, 2, 3, 1))                          # NHWC
    xp = jnp.pad(x, ((0, 0), (1, 1), (1, 1), (0, 0)),
                 mode="reflect").astype(jnp.bfloat16)
    p00 = xp[:, 0::2, 0::2, :]         # (N, Hq, Wq, C) each; fed separately
    p01 = xp[:, 0::2, 1::2, :]         # (no wrapper-side concatenate pass)
    p10 = xp[:, 1::2, 0::2, :]
    p11 = xp[:, 1::2, 1::2, :]

    # (Cout, 9*Cin) weights, row-major over (dy, dx, cin) to match the patch slab.
    w2 = jnp.transpose(w_hwio, (3, 0, 1, 2)).reshape(C, 9 * C).astype(jnp.bfloat16)

    # whole parity plane per batch element; index map ignores the row-tile axis so
    # the block stays resident across it (no re-DMA).
    # TODO(synk): on v7x with very large H*W*C, switch the planes to halo row-tiling
    # (TR+1 rows per step) and/or single buffering to keep TM large.
    plane_spec = pl.BlockSpec((None, Hq, Wq, C), lambda n, rt: (n, 0, 0, 0))

    kernel1 = functools.partial(conv_stats_kernel, Wo=Wo, TR=TR, C=C)
    y_cm, stats = pl.pallas_call(
        kernel1,
        out_shape=(
            jax.ShapeDtypeStruct((N, C, Ho * Wo), jnp.bfloat16),
            jax.ShapeDtypeStruct((N, n_rt, 2, C), jnp.float32),
        ),
        grid=(N, n_rt),
        in_specs=[
            plane_spec, plane_spec, plane_spec, plane_spec,
            pl.BlockSpec((C, 9 * C), lambda n, rt: (0, 0)),
        ],
        out_specs=(
            pl.BlockSpec((None, C, TM), lambda n, rt: (n, 0, rt)),
            pl.BlockSpec((None, None, 2, C), lambda n, rt: (n, rt, 0, 0)),
        ),
        compiler_params=pltpu.CompilerParams(
            dimension_semantics=("parallel", "parallel"),
            vmem_limit_bytes=vmem_limit),
    )(p00, p01, p10, p11, w2)

    # ---- tiny XLA reduction of per-block partials -> per-channel BN scale/shift ----
    count = N * Ho * Wo
    psum = stats[:, :, 0, :].sum(axis=(0, 1))            # (C,)
    psq = stats[:, :, 1, :].sum(axis=(0, 1))             # (C,)
    mean = psum / count
    var = jnp.maximum(psq / count - mean * mean, 0.0)    # biased var (training BN)
    inv = lax.rsqrt(var + BN_EPS)
    scale = (gamma * inv).reshape(C, 1).astype(jnp.float32)
    shift = (beta - mean * gamma * inv).reshape(C, 1).astype(jnp.float32)

    # ---- kernel 2: BN apply + LeakyReLU on the bf16 channel-major intermediate ----
    out_cm = pl.pallas_call(
        bn_act_kernel,
        out_shape=jax.ShapeDtypeStruct((N, C, Ho * Wo), jnp.float32),
        grid=(N, n_rt),
        in_specs=[
            pl.BlockSpec((None, C, TM), lambda n, rt: (n, 0, rt)),
            pl.BlockSpec((C, 1), lambda n, rt: (0, 0)),
            pl.BlockSpec((C, 1), lambda n, rt: (0, 0)),
        ],
        out_specs=pl.BlockSpec((None, C, TM), lambda n, rt: (n, 0, rt)),
        compiler_params=pltpu.CompilerParams(
            dimension_semantics=("parallel", "parallel"),
            vmem_limit_bytes=vmem_limit),
    )(y_cm, scale, shift)

    # channel-major layout already matches NCHW; only a free reshape remains.
    return out_cm.reshape(N, C, Ho, Wo)


def ref_forward(x_nchw, w_hwio, gamma, beta):
    """Pure-JAX reference of the PyTorch Down.forward (training-mode BatchNorm)."""
    xp = jnp.pad(x_nchw, ((0, 0), (0, 0), (1, 1), (1, 1)), mode="reflect")
    w_oihw = jnp.transpose(w_hwio, (3, 2, 0, 1))
    y = lax.conv_general_dilated(
        xp, w_oihw, window_strides=(2, 2), padding="VALID",
        dimension_numbers=("NCHW", "OIHW", "NCHW"))
    mean = y.mean(axis=(0, 2, 3), keepdims=True)
    var = y.var(axis=(0, 2, 3), keepdims=True)
    z = (y - mean) / jnp.sqrt(var + BN_EPS)
    z = z * gamma.reshape(1, -1, 1, 1) + beta.reshape(1, -1, 1, 1)
    return jnp.where(z >= 0, z, NEG_SLOPE * z)


if __name__ == "__main__":
    key = jax.random.PRNGKey(0)
    kx, kw, kg, kb = jax.random.split(key, 4)

    N, C, H, W = 2, 4, 16, 16
    x = jax.random.normal(kx, (N, C, H, W), dtype=jnp.float32)
    # Conv2d(channel, channel, 3) weight in HWIO layout; synthetic deterministic init.
    w_hwio = 0.1 * jax.random.normal(kw, (3, 3, C, C), dtype=jnp.float32)
    # BatchNorm affine params (perturbed from the 1/0 init to exercise them).
    gamma = 1.0 + 0.1 * jax.random.normal(kg, (C,), dtype=jnp.float32)
    beta = 0.1 * jax.random.normal(kb, (C,), dtype=jnp.float32)

    out = jax.block_until_ready(down_forward(x, w_hwio, gamma, beta))
    ref = jax.block_until_ready(ref_forward(x, w_hwio, gamma, beta))

    assert out.shape == (N, C, H // 2, W // 2), out.shape
    # bf16 matmul inputs + bf16 intermediate (f32 accumulation) -> small abs slack.
    max_err = float(jnp.max(jnp.abs(out - ref)))
    assert jnp.allclose(out, ref, atol=5e-2, rtol=5e-2), max_err

    print("KERNEL_OK")
</pallas_src>

<mosaic_0001>
module attributes {stable_mosaic.version = 11 : i64} {
  func.func @conv_stats_kernel(%arg0: i32, %arg1: i32, %arg2: memref<1x9x9x4xbf16, #tpu.memory_space<vmem>>, %arg3: memref<1x9x9x4xbf16, #tpu.memory_space<vmem>>, %arg4: memref<1x9x9x4xbf16, #tpu.memory_space<vmem>>, %arg5: memref<1x9x9x4xbf16, #tpu.memory_space<vmem>>, %arg6: memref<4x36xbf16, #tpu.memory_space<vmem>>, %arg7: memref<1x4x64xbf16, #tpu.memory_space<vmem>>, %arg8: memref<1x1x2x4xf32, #tpu.memory_space<vmem>>) attributes {dimension_semantics = [#tpu.dimension_semantics<parallel>, #tpu.dimension_semantics<parallel>], iteration_bounds = array<i64: 2, 1>, scalar_prefetch = 0 : i64, scratch_operands = 0 : i64, tpu.core_type = #tpu.core_type<tc>, window_params = [{transform_indices = @transform_0, window_bounds = array<i64: 1, 9, 9, 4>}, {transform_indices = @transform_1, window_bounds = array<i64: 1, 9, 9, 4>}, {transform_indices = @transform_2, window_bounds = array<i64: 1, 9, 9, 4>}, {transform_indices = @transform_3, window_bounds = array<i64: 1, 9, 9, 4>}, {pipeline_mode = #tpu.pipeline_mode<synchronous>, transform_indices = @transform_4, window_bounds = array<i64: 4, 36>}, {transform_indices = @transform_5, window_bounds = array<i64: 1, 4, 64>}, {transform_indices = @transform_6, window_bounds = array<i64: 1, 1, 2, 4>}]} {
    %c8_i32 = arith.constant 8 : i32
    %0 = arith.muli %arg1, %c8_i32 : i32
    %1 = tpu.assume_multiple %0, 8 : i32
    %c0_i32 = arith.constant 0 : i32
    %2 = arith.addi %1, %c0_i32 : i32
    %c0 = arith.constant 0 : index
    %3 = arith.index_cast %2 : i32 to index
    %c0_0 = arith.constant 0 : index
    %c0_1 = arith.constant 0 : index
    %4 = vector.load %arg2[%c0, %3, %c0_0, %c0_1] : memref<1x9x9x4xbf16, #tpu.memory_space<vmem>>, vector<1x8x8x4xbf16>
    %5 = vector.shape_cast %4 : vector<1x8x8x4xbf16> to vector<8x8x4xbf16>
    %6 = vector.shape_cast %5 : vector<8x8x4xbf16> to vector<64x4xbf16>
    %c0_i32_2 = arith.constant 0 : i32
    %7 = arith.addi %1, %c0_i32_2 : i32
    %c0_3 = arith.constant 0 : index
    %8 = arith.index_cast %7 : i32 to index
    %c0_4 = arith.constant 0 : index
    %c0_5 = arith.constant 0 : index
    %9 = vector.load %arg3[%c0_3, %8, %c0_4, %c0_5] : memref<1x9x9x4xbf16, #tpu.memory_space<vmem>>, vector<1x8x8x4xbf16>
    %10 = vector.shape_cast %9 : vector<1x8x8x4xbf16> to vector<8x8x4xbf16>
    %11 = vector.shape_cast %10 : vector<8x8x4xbf16> to vector<64x4xbf16>
    %c0_i32_6 = arith.constant 0 : i32
    %12 = arith.addi %1, %c0_i32_6 : i32
    %c0_7 = arith.constant 0 : index
    %13 = arith.index_cast %12 : i32 to index
    %c1 = arith.constant 1 : index
    %c0_8 = arith.constant 0 : index
    %14 = vector.load %arg2[%c0_7, %13, %c1, %c0_8] : memref<1x9x9x4xbf16, #tpu.memory_space<vmem>>, vector<1x8x8x4xbf16>
    %15 = vector.shape_cast %14 : vector<1x8x8x4xbf16> to vector<8x8x4xbf16>
    %16 = vector.shape_cast %15 : vector<8x8x4xbf16> to vector<64x4xbf16>
    %c0_i32_9 = arith.constant 0 : i32
    %17 = arith.addi %1, %c0_i32_9 : i32
    %c0_10 = arith.constant 0 : index
    %18 = arith.index_cast %17 : i32 to index
    %c0_11 = arith.constant 0 : index
    %c0_12 = arith.constant 0 : index
    %19 = vector.load %arg4[%c0_10, %18, %c0_11, %c0_12] : memref<1x9x9x4xbf16, #tpu.memory_space<vmem>>, vector<1x8x8x4xbf16>
    %20 = vector.shape_cast %19 : vector<1x8x8x4xbf16> to vector<8x8x4xbf16>
    %21 = vector.shape_cast %20 : vector<8x8x4xbf16> to vector<64x4xbf16>
    %c0_i32_13 = arith.constant 0 : i32
    %22 = arith.addi %1, %c0_i32_13 : i32
    %c0_14 = arith.constant 0 : index
    %23 = arith.index_cast %22 : i32 to index
    %c0_15 = arith.constant 0 : index
    %c0_16 = arith.constant 0 : index
    %24 = vector.load %arg5[%c0_14, %23, %c0_15, %c0_16] : memref<1x9x9x4xbf16, #tpu.memory_space<vmem>>, vector<1x8x8x4xbf16>
    %25 = vector.shape_cast %24 : vector<1x8x8x4xbf16> to vector<8x8x4xbf16>
    %26 = vector.shape_cast %25 : vector<8x8x4xbf16> to vector<64x4xbf16>
    %c0_i32_17 = arith.constant 0 : i32
    %27 = arith.addi %1, %c0_i32_17 : i32
    %c0_18 = arith.constant 0 : index
    %28 = arith.index_cast %27 : i32 to index
    %c1_19 = arith.constant 1 : index
    %c0_20 = arith.constant 0 : index
    %29 = vector.load %arg4[%c0_18, %28, %c1_19, %c0_20] : memref<1x9x9x4xbf16, #tpu.memory_space<vmem>>, vector<1x8x8x4xbf16>
    %30 = vector.shape_cast %29 : vector<1x8x8x4xbf16> to vector<8x8x4xbf16>
    %31 = vector.shape_cast %30 : vector<8x8x4xbf16> to vector<64x4xbf16>
    %c1_i32 = arith.constant 1 : i32
    %32 = arith.addi %1, %c1_i32 : i32
    %c0_21 = arith.constant 0 : index
    %33 = arith.index_cast %32 : i32 to index
    %c0_22 = arith.constant 0 : index
    %c0_23 = arith.constant 0 : index
    %34 = vector.load %arg2[%c0_21, %33, %c0_22, %c0_23] : memref<1x9x9x4xbf16, #tpu.memory_space<vmem>>, vector<1x8x8x4xbf16>
    %35 = vector.shape_cast %34 : vector<1x8x8x4xbf16> to vector<8x8x4xbf16>
    %36 = vector.shape_cast %35 : vector<8x8x4xbf16> to vector<64x4xbf16>
    %c1_i32_24 = arith.constant 1 : i32
    %37 = arith.addi %1, %c1_i32_24 : i32
    %c0_25 = arith.constant 0 : index
    %38 = arith.index_cast %37 : i32 to index
    %c0_26 = arith.constant 0 : index
    %c0_27 = arith.constant 0 : index
    %39 = vector.load %arg3[%c0_25, %38, %c0_26, %c0_27] : memref<1x9x9x4xbf16, #tpu.memory_space<vmem>>, vector<1x8x8x4xbf16>
    %40 = vector.shape_cast %39 : vector<1x8x8x4xbf16> to vector<8x8x4xbf16>
    %41 = vector.shape_cast %40 : vector<8x8x4xbf16> to vector<64x4xbf16>
    %c1_i32_28 = arith.constant 1 : i32
    %42 = arith.addi %1, %c1_i32_28 : i32
    %c0_29 = arith.constant 0 : index
    %43 = arith.index_cast %42 : i32 to index
    %c1_30 = arith.constant 1 : index
    %c0_31 = arith.constant 0 : index
    %44 = vector.load %arg2[%c0_29, %43, %c1_30, %c0_31] : memref<1x9x9x4xbf16, #tpu.memory_space<vmem>>, vector<1x8x8x4xbf16>
    %45 = vector.shape_cast %44 : vector<1x8x8x4xbf16> to vector<8x8x4xbf16>
    %46 = vector.shape_cast %45 : vector<8x8x4xbf16> to vector<64x4xbf16>
    %47 = tpu.concatenate %6, %11, %16, %21, %26, %31, %36, %41, %46 in 1 : vector<64x4xbf16>, vector<64x4xbf16>, vector<64x4xbf16>, vector<64x4xbf16>, vector<64x4xbf16>, vector<64x4xbf16>, vector<64x4xbf16>, vector<64x4xbf16>, vector<64x4xbf16> -> vector<64x36xbf16>
    %c0_32 = arith.constant 0 : index
    %c0_33 = arith.constant 0 : index
    %48 = vector.load %arg6[%c0_32, %c0_33] : memref<4x36xbf16, #tpu.memory_space<vmem>>, vector<4x36xbf16>
    %cst = arith.constant dense<0.000000e+00> : vector<4x64xf32>
    %49 = tpu.matmul %48, %47, %cst {dimension_numbers = #tpu.dot_dimension_numbers<[1], [1], [0], [0], [0, 0, 1, 0], [], []>} : vector<4x36xbf16>, vector<64x36xbf16>, vector<4x64xf32> -> vector<4x64xf32>
    %50 = arith.truncf %49 : vector<4x64xf32> to vector<4x64xbf16>
    %c0_34 = arith.constant 0 : index
    %c0_35 = arith.constant 0 : index
    %c0_36 = arith.constant 0 : index
    %51 = vector.load %arg7[%c0_34, %c0_35, %c0_36] : memref<1x4x64xbf16, #tpu.memory_space<vmem>>, vector<1x4x64xbf16>
    %52 = vector.shape_cast %51 : vector<1x4x64xbf16> to vector<4x64xbf16>
    %53 = vector.shape_cast %50 : vector<4x64xbf16> to vector<1x4x64xbf16>
    tpu.vector_store %arg7[%c0_34, %c0_35, %c0_36], %53 {strides = array<i32>} : memref<1x4x64xbf16, #tpu.memory_space<vmem>>, vector<1x4x64xbf16>,
    %cst_37 = arith.constant dense<0.000000e+00> : vector<4xf32>
    %54 = vector.multi_reduction <add>, %49, %cst_37 [1] : vector<4x64xf32> to vector<4xf32>
    %55 = vector.shape_cast %54 : vector<4xf32> to vector<4x1xf32>
    %56 = arith.mulf %49, %49 : vector<4x64xf32>
    %cst_38 = arith.constant dense<0.000000e+00> : vector<4xf32>
    %57 = vector.multi_reduction <add>, %56, %cst_38 [1] : vector<4x64xf32> to vector<4xf32>
    %58 = vector.shape_cast %57 : vector<4xf32> to vector<4x1xf32>
    %59 = tpu.concatenate %55, %58 in 1 : vector<4x1xf32>, vector<4x1xf32> -> vector<4x2xf32>
    %60 = tpu.transpose %59, [1, 0] : vector<4x2xf32> -> vector<2x4xf32>
    %c0_39 = arith.constant 0 : index
    %c0_40 = arith.constant 0 : index
    %c0_41 = arith.constant 0 : index
    %c0_42 = arith.constant 0 : index
    %61 = vector.load %arg8[%c0_39, %c0_40, %c0_41, %c0_42] : memref<1x1x2x4xf32, #tpu.memory_space<vmem>>, vector<1x1x2x4xf32>
    %62 = vector.shape_cast %61 : vector<1x1x2x4xf32> to vector<2x4xf32>
    %63 = vector.shape_cast %60 : vector<2x4xf32> to vector<1x1x2x4xf32>
    tpu.vector_store %arg8[%c0_39, %c0_40, %c0_41, %c0_42], %63 {strides = array<i32>} : memref<1x1x2x4xf32, #tpu.memory_space<vmem>>, vector<1x1x2x4xf32>,
    return
  }
  func.func @transform_0(%arg0: i32, %arg1: i32) -> (i32, i32, i32, i32) {
    %c0_i32 = arith.constant 0 : i32
    %c0_i32_0 = arith.constant 0 : i32
    %c0_i32_1 = arith.constant 0 : i32
    %c0_i32_2 = arith.constant 0 : i32
    return %arg0, %c0_i32, %c0_i32_0, %c0_i32_1 : i32, i32, i32, i32
  }
  func.func @transform_1(%arg0: i32, %arg1: i32) -> (i32, i32, i32, i32) {
    %c0_i32 = arith.constant 0 : i32
    %c0_i32_0 = arith.constant 0 : i32
    %c0_i32_1 = arith.constant 0 : i32
    %c0_i32_2 = arith.constant 0 : i32
    return %arg0, %c0_i32, %c0_i32_0, %c0_i32_1 : i32, i32, i32, i32
  }
  func.func @transform_2(%arg0: i32, %arg1: i32) -> (i32, i32, i32, i32) {
    %c0_i32 = arith.constant 0 : i32
    %c0_i32_0 = arith.constant 0 : i32
    %c0_i32_1 = arith.constant 0 : i32
    %c0_i32_2 = arith.constant 0 : i32
    return %arg0, %c0_i32, %c0_i32_0, %c0_i32_1 : i32, i32, i32, i32
  }
  func.func @transform_3(%arg0: i32, %arg1: i32) -> (i32, i32, i32, i32) {
    %c0_i32 = arith.constant 0 : i32
    %c0_i32_0 = arith.constant 0 : i32
    %c0_i32_1 = arith.constant 0 : i32
    %c0_i32_2 = arith.constant 0 : i32
    return %arg0, %c0_i32, %c0_i32_0, %c0_i32_1 : i32, i32, i32, i32
  }
  func.func @transform_4(%arg0: i32, %arg1: i32) -> (i32, i32) {
    %c0_i32 = arith.constant 0 : i32
    %c0_i32_0 = arith.constant 0 : i32
    %c0_i32_1 = arith.constant 0 : i32
    return %c0_i32, %c0_i32_0 : i32, i32
  }
  func.func @transform_5(%arg0: i32, %arg1: i32) -> (i32, i32, i32) {
    %c0_i32 = arith.constant 0 : i32
    %c0_i32_0 = arith.constant 0 : i32
    return %arg0, %c0_i32, %arg1 : i32, i32, i32
  }
  func.func @transform_6(%arg0: i32, %arg1: i32) -> (i32, i32, i32, i32) {
    %c0_i32 = arith.constant 0 : i32
    %c0_i32_0 = arith.constant 0 : i32
    %c0_i32_1 = arith.constant 0 : i32
    return %arg0, %arg1, %c0_i32, %c0_i32_0 : i32, i32, i32, i32
  }
}

module attributes {stable_mosaic.version = 11 : i64} {
  func.func @bn_act_kernel(%arg0: i32, %arg1: i32, %arg2: memref<1x4x64xbf16, #tpu.memory_space<vmem>>, %arg3: memref<4x1xf32, #tpu.memory_space<vmem>>, %arg4: memref<4x1xf32, #tpu.memory_space<vmem>>, %arg5: memref<1x4x64xf32, #tpu.memory_space<vmem>>) attributes {dimension_semantics = [#tpu.dimension_semantics<parallel>, #tpu.dimension_semantics<parallel>], iteration_bounds = array<i64: 2, 1>, scalar_prefetch = 0 : i64, scratch_operands = 0 : i64, tpu.core_type = #tpu.core_type<tc>, window_params = [{transform_indices = @transform_0, window_bounds = array<i64: 1, 4, 64>}, {pipeline_mode = #tpu.pipeline_mode<synchronous>, transform_indices = @transform_1, window_bounds = array<i64: 4, 1>}, {pipeline_mode = #tpu.pipeline_mode<synchronous>, transform_indices = @transform_2, window_bounds = array<i64: 4, 1>}, {transform_indices = @transform_3, window_bounds = array<i64: 1, 4, 64>}]} {
    %c0 = arith.constant 0 : index
    %c0_0 = arith.constant 0 : index
    %c0_1 = arith.constant 0 : index
    %0 = vector.load %arg2[%c0, %c0_0, %c0_1] : memref<1x4x64xbf16, #tpu.memory_space<vmem>>, vector<1x4x64xbf16>
    %1 = vector.shape_cast %0 : vector<1x4x64xbf16> to vector<4x64xbf16>
    %2 = arith.extf %1 : vector<4x64xbf16> to vector<4x64xf32>
    %c0_2 = arith.constant 0 : index
    %c0_3 = arith.constant 0 : index
    %3 = vector.load %arg3[%c0_2, %c0_3] : memref<4x1xf32, #tpu.memory_space<vmem>>, vector<4x1xf32>
    %4 = vector.broadcast %3 : vector<4x1xf32> to vector<4x64xf32>
    %5 = arith.mulf %2, %4 : vector<4x64xf32>
    %c0_4 = arith.constant 0 : index
    %c0_5 = arith.constant 0 : index
    %6 = vector.load %arg4[%c0_4, %c0_5] : memref<4x1xf32, #tpu.memory_space<vmem>>, vector<4x1xf32>
    %7 = vector.broadcast %6 : vector<4x1xf32> to vector<4x64xf32>
    %8 = arith.addf %5, %7 : vector<4x64xf32>
    %cst = arith.constant 0.000000e+00 : f32
    %9 = vector.broadcast %cst : f32 to vector<4x64xf32>
    %10 = arith.cmpf oge, %8, %9 : vector<4x64xf32>
    %cst_6 = arith.constant 0.00999999977 : f32
    %11 = vector.broadcast %cst_6 : f32 to vector<4x64xf32>
    %12 = arith.mulf %11, %8 : vector<4x64xf32>
    %13 = arith.select %10, %8, %12 : vector<4x64xi1>, vector<4x64xf32>
    %c0_7 = arith.constant 0 : index
    %c0_8 = arith.constant 0 : index
    %c0_9 = arith.constant 0 : index
    %14 = vector.load %arg5[%c0_7, %c0_8, %c0_9] : memref<1x4x64xf32, #tpu.memory_space<vmem>>, vector<1x4x64xf32>
    %15 = vector.shape_cast %14 : vector<1x4x64xf32> to vector<4x64xf32>
    %16 = vector.shape_cast %13 : vector<4x64xf32> to vector<1x4x64xf32>
    tpu.vector_store %arg5[%c0_7, %c0_8, %c0_9], %16 {strides = array<i32>} : memref<1x4x64xf32, #tpu.memory_space<vmem>>, vector<1x4x64xf32>,
    return
  }
  func.func @transform_0(%arg0: i32, %arg1: i32) -> (i32, i32, i32) {
    %c0_i32 = arith.constant 0 : i32
    %c0_i32_0 = arith.constant 0 : i32
    return %arg0, %c0_i32, %arg1 : i32, i32, i32
  }
  func.func @transform_1(%arg0: i32, %arg1: i32) -> (i32, i32) {
    %c0_i32 = arith.constant 0 : i32
    %c0_i32_0 = arith.constant 0 : i32
    %c0_i32_1 = arith.constant 0 : i32
    return %c0_i32, %c0_i32_0 : i32, i32
  }
  func.func @transform_2(%arg0: i32, %arg1: i32) -> (i32, i32) {
    %c0_i32 = arith.constant 0 : i32
    %c0_i32_0 = arith.constant 0 : i32
    %c0_i32_1 = arith.constant 0 : i32
    return %c0_i32, %c0_i32_0 : i32, i32
  }
  func.func @transform_3(%arg0: i32, %arg1: i32) -> (i32, i32, i32) {
    %c0_i32 = arith.constant 0 : i32
    %c0_i32_0 = arith.constant 0 : i32
    return %arg0, %c0_i32, %arg1 : i32, i32, i32
  }
}

</mosaic_0001>

<bundles_post_ra>
// kernel: down_forward.3
= control target key start
LH: loop header
LB: loop body
LE: loop exit
PB: predicated region body
PF: predicated region fallthrough
CT: control target
= control target key end

     0   :  { %s372_s12 = smov 0   ;;  %s374_s13 = smov 0   ;;  %s411_s0 = inlined_call_operand.vmem [shape: bf16[2,4,64], index: 0, kind: input, shape index: {}]   ;;  %s412_s1 = inlined_call_operand.vmem [shape: f32[4,1], index: 1, kind: input, shape index: {}]   ;;  %s413_s2 = inlined_call_operand.vmem [shape: f32[4,1], index: 2, kind: input, shape index: {}]   ;;  %s414_s3 = inlined_call_operand.vmem [shape: f32[2,4,64], index: 3, kind: output, shape index: {}]  }
   0x1   :  { %s376_s14 = smov 0  }
   0x2 LB: > { %s25_s15 = sadd.s32 1, %s345_s13  ;;  %p296_p0 = scmp.ge.s32.totalorder %s349_s14, 1  ;;  %s349_s14 = sphi %s376_s14, %s13_s14   ;;  %s345_s13 = sphi %s374_s13, %s416_s13   ;;  %s341_s12 = sphi %s372_s12, %s415_s12  }
   0x3   : > { %p27_p1 = scmp.ge.s32.totalorder %s25_s15, 2  ;;  %p155_p2 = scmp.lt.s32.totalorder %s349_s14, 3 }
   0x5   : > { %s418_s15 = smov (%p27_p1, %s25_s15), 0  ;;  %p156_p3 = pnand %p296_p0, %p155_p2 }
   0x6   : > { %v199_v0 = vld [vmem:[%s412_s1] sm:$0xf] (!%p156_p3)  ;;  %v351_v1 = vmov (!%p156_p3), 0   ;;  %p183_p4 = scmp.lt.s32.totalorder (!%p156_p3), %s341_s12, 1  ;;  %vm216_vm0 = vcmask (!%p156_p3), 519168  }
   0x7   : > { %159 = sbr.rel (%p156_p3) target bundleno = 146 (0x92), region = 32  ;;  %326 = vset.pattern.permute.xlu0 (!%p156_p3), %v351_v1  ;;  %v206_v2 = vld [vmem:[%s413_s2] sm:$0xf] (!%p156_p3) }
   0x8   : > { %202 = vperm.xlu0 (!%p156_p3), %326, %v199_v0  }
   0xc   : > { %209 = vperm.xlu0 (!%p156_p3), %326, %v206_v2  }
   0xe   : > { %s420_s12 = smov (!%p183_p4, %s341_s12), 1 }
   0xf   : > { %s297_s20 = sshll.u32 %s420_s12, 1  ;;  %s298_s24 = sshll.u32 %s420_s12, 2 }
  0x10   : > { %s189_s23 = scalar_lea.vmem %s411_s0, %s297_s20  ;;  %s196_s27 = scalar_lea.vmem %s414_s3, %s298_s24 }
  0x11   : > { %v197_v3 = vld [vmem:[%s189_s23] sm:$0x3] }
  0x12   : > { %v198_v4 = vunpack.c.l.bf16 %v197_v3 }
  0x87   : > { %v203_v5 = vpop.permute.xlu0 %202 }
  0x88   : > { %v205_v6 = vmul.f32 %v203_v5, %v198_v4 }
  0x8b   : > { %v210_v7 = vpop.permute.xlu0 %209 }
  0x8c   : > { %v212_v8 = vadd.f32 %v210_v7, %v205_v6 }
  0x8e   : > { %vm213_vm1 = vcmp.ge.f32.partialorder %v212_v8, 0.0  ;;  %v214_v9 = vmul.f32 0.01, %v212_v8 }
  0x90   : > { %v215_v10 = vsel %vm213_vm1, %v212_v8, %v214_v9 }
  0x91   : > { %217 = vst.msk [vmem:[%s196_s27] sm:$0xf] %vm216_vm0, %v215_v10 }
  0x92 PF: > { %s13_s14 = sadd.s32 1, %s349_s14   ;;  %s415_s12 = smov %s345_s13 }
  0x93   : > { %p10_p5 = scmp.ge.s32.totalorder %s13_s14, 4   ;;  %s416_s13 = smov %s418_s15 }
  0x95   :  { %12 = sbr.rel (!%p10_p5) target bundleno = 2 (0x2), region = 62 }

// kernel: down_forward.2
= control target key start
LH: loop header
LB: loop body
LE: loop exit
PB: predicated region body
PF: predicated region fallthrough
CT: control target
= control target key end

     0   :  { %s1556_s21 = smov 0   ;;  %s1558_s22 = smov 0   ;;  %s1904_s0 = inlined_call_operand.vmem [shape: bf16[2,9,9,4], index: 0, kind: input, shape index: {}]   ;;  %s1905_s1 = inlined_call_operand.vmem [shape: bf16[2,9,9,4], index: 1, kind: input, shape index: {}]   ;;  %s1906_s2 = inlined_call_operand.vmem [shape: bf16[2,9,9,4], index: 2, kind: input, shape index: {}]   ;;  %s1907_s3 = inlined_call_operand.vmem [shape: bf16[2,9,9,4], index: 3, kind: input, shape index: {}]   ;;  %s1908_s4 = inlined_call_operand.vmem [shape: bf16[4,36], index: 4, kind: input, shape index: {}]   ;;  %s1909_s5 = inlined_call_operand.vmem [shape: bf16[2,4,64], index: 5, kind: output, shape index: {0}]   ;;  %s1910_s6 = inlined_call_operand.vmem [shape: f32[2,1,2,4], index: 6, kind: output, shape index: {1}]  }
   0x1   :  { %s1560_s23 = smov 0  }
   0x2 LB: > { %s29_s24 = sadd.s32 1, %s1505_s22  ;;  %p1341_p0 = scmp.ge.s32.totalorder %s1509_s23, 1  ;;  %s1509_s23 = sphi %s1560_s23, %s17_s23   ;;  %s1505_s22 = sphi %s1558_s22, %s1914_s22   ;;  %s1501_s21 = sphi %s1556_s21, %s1913_s21  }
   0x3   : > { %p31_p1 = scmp.ge.s32.totalorder %s29_s24, 2  ;;  %p261_p2 = scmp.lt.s32.totalorder %s1509_s23, 3 }
   0x5   : > { %s1916_s24 = smov (%p31_p1, %s29_s24), 0  ;;  %p262_p3 = pnand %p1341_p0, %p261_p2 }
   0x6   : > { %p315_p4 = scmp.lt.s32.totalorder (!%p262_p3), %s1501_s21, 1  ;;  %vm380_vm0 = vsmask.f32 (!%p262_p3), 3328  ;;  %vm381_vm1 = vsmask.f32 (!%p262_p3), 7440  ;;  %s1511_s14 = smov (!%p262_p3), 12  }
   0x7   : > { %265 = sbr.rel (%p262_p3) target bundleno = 701 (0x2bd), region = 40  ;;  %s1512_s15 = smov (!%p262_p3), 4   ;;  %vm1623_vm2 = vmor (!%p262_p3), %vm380_vm0, %vm381_vm1  ;;  %vm1520_vm3 = vmmov (!%p262_p3), 0   ;;  %vm997_vm4 = vcmask (!%p262_p3), 31744   ;;  %vm1010_vm5 = vcmask (!%p262_p3), 64512   ;;  %vm1019_vm6 = vcmask (!%p262_p3), 97280  }
   0x8   : > { %s1513_s16 = smov (!%p262_p3), 16   ;;  %s1514_s17 = smov (!%p262_p3), 28   ;;  %vm1028_vm7 = vcmask (!%p262_p3), 130048   ;;  %vm1037_vm8 = vcmask (!%p262_p3), 162816   ;;  %vm1046_vm9 = vcmask (!%p262_p3), 195584   ;;  %vm1055_vm10 = vcmask (!%p262_p3), 228352  }
   0x9   : > { %s1515_s18 = smov (!%p262_p3), 24   ;;  %s1516_s19 = smov (!%p262_p3), 32   ;;  %vm1064_vm11 = vcmask (!%p262_p3), 261120   ;;  %vm1074_vm12 = vcmask (!%p262_p3), 293888   ;;  %vm1129_vm13 = vcmask (!%p262_p3), 519168   ;;  %vm1127_vm14 = vcmask (!%p262_p3), 517120  }
   0xa   : > { %s1517_s20 = smov (!%p262_p3), 8   ;;  %vm1137_vm15 = vcmask (!%p262_p3), 7168   ;;  %vm1171_vm0 = vcmask (!%p262_p3), 25600  }
   0xe   : > { %s1918_s21 = smov (!%p315_p4, %s1501_s21), 1 }
   0xf   : > { %s1428_s25 = smul.u32 72, %s1918_s21 }
  0x11   : > { %s1580_s28 = scalar_lea.vmem %s1906_s2, %s1428_s25  ;;  %s1585_s7 = scalar_lea.vmem %s1904_s0, %s1428_s25 }
  0x12   : > { %v497_v0 = vld [vmem:[%s1580_s28] sm:$0xf]  ;;  %v498_v1 = vld [vmem:[%s1580_s28 + $0x8] sm:$0xf]  ;;  %s1592_s10 = scalar_lea.vmem %s1905_s1, %s1428_s25  ;;  %s1598_s13 = scalar_lea.vmem %s1907_s3, %s1428_s25  ;;  %v1349_v22 = vld [vmem:[%s1585_s7 + $0x10] sm:$0xf] }
  0x13   : > { %v1348_v2 = vld [vmem:[%s1585_s7 + $0x8] sm:$0xf]  ;;  %v538_v3 = vshrl.u32 %v498_v1, 16  ;;  %v541_v4 = vshll.u32 %v498_v1, 16  ;;  %v1384_v5 = vcombine.low %v497_v0, %v498_v1  ;;  %v524_v6 = vshrl.u32 %v497_v0, 16  ;;  %s1518_s25 = smov 20  }
  0x14   : > { %v527_v7 = vshll.u32 %v497_v0, 16  ;;  %v1464_v8 = vld [vmem:[%s1592_s10] ss:$8 sps:$4 sm:$0xff]   ;;  %v666_v9 = vshrl.u32 %v1348_v2, 16  ;;  %v669_v13 = vshll.u32 %v1348_v2, 16  ;;  %v680_v26 = vshrl.u32 %v1349_v22, 16 }
  0x15   : > { %v540_v10 = vrot.slane %v538_v3, 4  ;;  %v543_v11 = vrot.slane %v541_v4, 5  ;;  %865 = vrot.lane.b32.xlu1 %v1384_v5, %s1511_s14  ;;  %v526_v12 = vrot.slane %v524_v6, 4  ;;  %817 = vrot.lane.b32.xlu0 %v1464_v8, %s1512_s15  ;;  %v1465_v15 = vld [vmem:[%s1598_s13] ss:$8 sps:$4 sm:$0xff]   ;;  %v683_v27 = vshll.u32 %v1349_v22, 16 }
  0x16   : > { %v529_v14 = vrot.slane %v527_v7, 5  ;;  %v668_v16 = vrot.slane %v666_v9, 4  ;;  %v1466_v18 = vld [vmem:[%s1592_s10 + $0x8] ss:$8 sps:$4 sm:$0xff]   ;;  %v671_v23 = vrot.slane %v669_v13, 5  ;;  %v1396_v28 = vcombine.low %v1348_v2, %v1349_v22 }
  0x17   : > { %v544_v17 = vor.u32 %v543_v11, %v540_v10  ;;  %v1467_v20 = vld [vmem:[%s1592_s10 + $0x10] ss:$8 sps:$4 sm:$0xff]   ;;  %v1364_v24 = vld [vmem:[%s1585_s7 + $0xc] sm:$0x1]  ;;  %v1365_v29 = vld [vmem:[%s1585_s7 + $0x14] sm:$0x1] }
  0x18   : > { %v530_v19 = vor.u32 %v529_v14, %v526_v12  ;;  %v672_v30 = vor.u32 %v671_v23, %v668_v16  ;;  %v675_v31 = vshll.u32 %v1364_v24, 16  ;;  %v689_v32 = vshll.u32 %v1365_v29, 16  ;;  %v1616_v33 = vld [vmem:[%s1585_s7] sm:$0xf]  ;;  %v1619_v34 = vld [vmem:[%s1585_s7 + $0x8] sm:$0xf] }
  0x19   : > { %v1606_v21 = vrot.slane %v544_v17, 4  ;;  %893 = vrot.lane.b32.xlu1 %v1465_v15, %s1513_s16  ;;  %969 = vrot.lane.b32.xlu0 %v1466_v18, %s1514_s17  ;;  %v682_v35 = vrot.slane %v680_v26, 4  ;;  %v685_v36 = vrot.slane %v683_v27, 5  ;;  %v372_v38 = vld [vmem:[%s1585_s7 + $0x4] sm:$0x1]  ;;  %v1372_v40 = vcombine.low %v1616_v33, %v1619_v34 }
  0x1a   : > { %v1611_v25 = vrot.slane %v530_v19, 4  ;;  %v373_v39 = vld [vmem:[%s1585_s7 + $0xc] sm:$0x1]  ;;  %v673_v41 = vrot.slane %v672_v30, 4  ;;  %v677_v42 = vrot.slane %v675_v31, 5  ;;  %v691_v43 = vrot.slane %v689_v32, 5 }
  0x1b   : > { %v384_v44 = vshrl.u32 %v1616_v33, 16  ;;  %v1634_v45 = vld [vmem:[%s1585_s7 + $0x10] sm:$0xf]  ;;  %v686_v46 = vor.u32 %v685_v36, %v682_v35  ;;  %v387_v47 = vshll.u32 %v1616_v33, 16  ;;  %v393_v48 = vshll.u32 %v372_v38, 16 }
  0x1c   : > { %v398_v49 = vshrl.u32 %v1619_v34, 16  ;;  %v1640_v50 = vld [vmem:[%s1585_s7 + $0x18] sm:$0xf]  ;;  %v678_v51 = vsel %vm1623_vm2, %v673_v41, %v677_v42  ;;  %v401_v53 = vshll.u32 %v1619_v34, 16  ;;  %v407_v54 = vshll.u32 %v373_v39, 16 }
  0x1d   : > { %941 = vrot.lane.b32.xlu1 %v1396_v28, %s1515_s18  ;;  %819 = vrot.lane.b32.xlu0 %v1467_v20, %s1512_s15  ;;  %v386_v52 = vrot.slane %v384_v44, 4  ;;  %v374_v55 = vld [vmem:[%s1585_s7 + $0x14] sm:$0x1]  ;;  %v687_v56 = vrot.slane %v686_v46, 4  ;;  %v389_v57 = vrot.slane %v387_v47, 5  ;;  %v395_v58 = vrot.slane %v393_v48, 5 }
  0x1e   : > { %v400_v59 = vrot.slane %v398_v49, 4  ;;  %v403_v60 = vrot.slane %v401_v53, 5  ;;  %v409_v61 = vrot.slane %v407_v54, 5  ;;  %v375_v62 = vld [vmem:[%s1585_s7 + $0x1c] sm:$0x1]  ;;  %v412_v63 = vshrl.u32 %v1634_v45, 16 }
  0x1f   : > { %v415_v0 = vshll.u32 %v1634_v45, 16  ;;  %v692_v1 = vsel %vm1623_vm2, %v687_v56, %v691_v43  ;;  %v390_v2 = vor.u32 %v389_v57, %v386_v52  ;;  %v421_v3 = vshll.u32 %v374_v55, 16  ;;  %v515_v5 = vld [vmem:[%s1580_s28 + $0x4] sm:$0x1]  ;;  %v516_v6 = vld [vmem:[%s1580_s28 + $0xc] sm:$0x1] }
  0x20   : > { %v426_v4 = vshrl.u32 %v1640_v50, 16  ;;  %v1404_v7 = vcombine.low %v678_v51, %v692_v1  ;;  %v404_v8 = vor.u32 %v403_v60, %v400_v59  ;;  %v414_v9 = vrot.slane %v412_v63, 4  ;;  %v1655_v11 = vld [vmem:[%s1580_s28 + $0x10] sm:$0xf]  ;;  %v500_v24 = vld [vmem:[%s1580_s28 + $0x18] sm:$0xf] }
  0x21   : > { %v417_v10 = vrot.slane %v415_v0, 5  ;;  %v391_v12 = vrot.slane %v390_v2, 4  ;;  %v423_v13 = vrot.slane %v421_v3, 5  ;;  %v429_v15 = vshll.u32 %v1640_v50, 16  ;;  %v517_v31 = vld [vmem:[%s1580_s28 + $0x14] sm:$0x1] }
  0x22   : > { %v428_v14 = vrot.slane %v426_v4, 4  ;;  %989 = vrot.lane.b32.xlu1 %v1404_v7, %s1516_s19  ;;  %v405_v16 = vrot.slane %v404_v8, 4  ;;  %v435_v18 = vshll.u32 %v375_v62, 16  ;;  %v533_v19 = vshll.u32 %v515_v5, 16  ;;  %v518_v39 = vld [vmem:[%s1580_s28 + $0x1c] sm:$0x1] }
  0x23   : > { %v418_v17 = vor.u32 %v417_v10, %v414_v9  ;;  %v396_v20 = vsel %vm1623_vm2, %v391_v12, %v395_v58  ;;  %v431_v22 = vrot.slane %v429_v15, 5  ;;  %v547_v23 = vshll.u32 %v516_v6, 16  ;;  %v1668_v41 = vld [vmem:[%s1585_s7 + $0x18] sm:$0xf]  ;;  %v1682_v52 = vld [vmem:[%s1585_s7 + $0x20] sm:$0xf] }
  0x24   : > { %v552_v26 = vshrl.u32 %v1655_v11, 16  ;;  %v410_v27 = vsel %vm1623_vm2, %v405_v16, %v409_v61  ;;  %v437_v29 = vrot.slane %v435_v18, 5  ;;  %v535_v30 = vrot.slane %v533_v19, 5  ;;  %v1366_v56 = vld [vmem:[%s1585_s7 + $0x1c] sm:$0x1] }
  0x25   : > { %v419_v28 = vrot.slane %v418_v17, 4  ;;  %v1380_v32 = vcombine.low %v396_v20, %v410_v27  ;;  %v432_v35 = vor.u32 %v431_v22, %v428_v14  ;;  %v549_v36 = vrot.slane %v547_v23, 5  ;;  %v1367_v0 = vld [vmem:[%s1585_s7 + $0x24] sm:$0x1]  ;;  %v1693_v5 = vld [vmem:[%s1585_s7 + $0x20] sm:$0xf] }
  0x26   : > { %v554_v38 = vrot.slane %v552_v26, 4  ;;  %v536_v43 = vsel %vm1623_vm2, %v1611_v25, %v535_v30  ;;  %v555_v44 = vshll.u32 %v1655_v11, 16  ;;  %v566_v46 = vshrl.u32 %v500_v24, 16  ;;  %v1470_v6 = vld [vmem:[%s1598_s13 + $0x10] ss:$8 sps:$4 sm:$0xff]  }
  0x27   : > { %v424_v42 = vsel %vm1623_vm2, %v419_v28, %v423_v13  ;;  %837 = vrot.lane.b32.xlu0 %v1380_v32, %s1517_s20  ;;  %v433_v47 = vrot.slane %v432_v35, 4  ;;  %v550_v48 = vsel %vm1623_vm2, %v1606_v21, %v549_v36  ;;  %v569_v49 = vshll.u32 %v500_v24, 16  ;;  %v1701_v15 = vld [vmem:[%s1585_s7 + $0x28] sm:$0xf]  ;;  %v376_v19 = vld [vmem:[%s1585_s7 + $0x24] sm:$0x1] }
  0x28   : > { %v1385_v51 = vcombine.low %v1655_v11, %v500_v24  ;;  %v1392_v53 = vcombine.low %v536_v43, %v550_v48  ;;  %v557_v54 = vrot.slane %v555_v44, 5  ;;  %v568_v25 = vrot.slane %v566_v46, 4  ;;  %v377_v20 = vld [vmem:[%s1585_s7 + $0x2c] sm:$0x1]  ;;  %v1713_v28 = vld [vmem:[%s1580_s28 + $0x20] sm:$0xf] }
  0x29   : > { %v561_v55 = vshll.u32 %v517_v31, 16  ;;  %v438_v57 = vsel %vm1623_vm2, %v433_v47, %v437_v29  ;;  %v571_v58 = vrot.slane %v569_v49, 5  ;;  %v575_v59 = vshll.u32 %v518_v39, 16  ;;  %v1472_v35 = vld [vmem:[%s1592_s10 + $0x18] ss:$8 sps:$4 sm:$0xff]  }
  0x2a   : > { %v694_v21 = vshrl.u32 %v1668_v41, 16  ;;  %v1381_v60 = vcombine.low %v424_v42, %v438_v57  ;;  %v558_v61 = vor.u32 %v557_v54, %v554_v38  ;;  %v697_v63 = vshll.u32 %v1668_v41, 16  ;;  %v1720_v42 = vld [vmem:[%s1580_s28 + $0x28] sm:$0xf]  ;;  %v519_v48 = vld [vmem:[%s1580_s28 + $0x24] sm:$0x1] }
  0x2b   : > { %v563_v62 = vrot.slane %v561_v55, 5  ;;  %913 = vrot.lane.b32.xlu0 %v1392_v53, %s1518_s25  ;;  %v572_v1 = vor.u32 %v571_v58, %v568_v25  ;;  %v577_v2 = vrot.slane %v575_v59, 5  ;;  %v708_v4 = vshrl.u32 %v1682_v52, 16  ;;  %v520_v54 = vld [vmem:[%s1580_s28 + $0x2c] sm:$0x1] }
  0x2c   : > { %v696_v3 = vrot.slane %v694_v21, 4  ;;  %839 = vrot.lane.b32.xlu1 %v1381_v60, %s1517_s20  ;;  %v559_v7 = vrot.slane %v558_v61, 4  ;;  %v699_v8 = vrot.slane %v697_v63, 5  ;;  %v711_v9 = vshll.u32 %v1682_v52, 16  ;;  %v1733_v58 = vld [vmem:[%s1585_s7 + $0x28] sm:$0xf] }
  0x2d   : > { %v1397_v10 = vcombine.low %v1668_v41, %v1682_v52  ;;  %v573_v11 = vrot.slane %v572_v1, 4  ;;  %v710_v12 = vrot.slane %v708_v4, 4  ;;  %v703_v13 = vshll.u32 %v1366_v56, 16 }
  0x2e   : > { %v717_v14 = vshll.u32 %v1367_v0, 16  ;;  %v564_v16 = vsel %vm1623_vm2, %v559_v7, %v563_v62  ;;  %v713_v17 = vrot.slane %v711_v9, 5  ;;  %v700_v18 = vor.u32 %v699_v8, %v696_v3  ;;  %v1737_v62 = vld [vmem:[%s1585_s7 + $0x30] sm:$0xf]  ;;  %v1473_v3 = vld [vmem:[%s1592_s10 + $0x20] ss:$8 sps:$4 sm:$0xff]  }
  0x2f   : > { %v440_v22 = vshrl.u32 %v1693_v5, 16  ;;  %867 = vrot.lane.b32.xlu0 %v1385_v51, %s1511_s14  ;;  %v578_v23 = vsel %vm1623_vm2, %v573_v11, %v577_v2  ;;  %v705_v24 = vrot.slane %v703_v13, 5  ;;  %v443_v27 = vshll.u32 %v1693_v5, 16  ;;  %v1368_v13 = vld [vmem:[%s1585_s7 + $0x2c] sm:$0x1] }
  0x30   : > { %v719_v26 = vrot.slane %v717_v14, 5  ;;  %895 = vrot.lane.b32.xlu1 %v1470_v6, %s1513_s16  ;;  %v1393_v29 = vcombine.low %v564_v16, %v578_v23  ;;  %v701_v30 = vrot.slane %v700_v18, 4  ;;  %v714_v31 = vor.u32 %v713_v17, %v710_v12 }
  0x31   : > { %v442_v32 = vrot.slane %v440_v22, 4  ;;  %v445_v36 = vrot.slane %v443_v27, 5  ;;  %v449_v38 = vshll.u32 %v376_v19, 16  ;;  %v454_v39 = vshrl.u32 %v1701_v15, 16  ;;  %v1369_v19 = vld [vmem:[%s1585_s7 + $0x34] sm:$0x1] }
  0x32   : > { %v457_v41 = vshll.u32 %v1701_v15, 16  ;;  %v706_v43 = vsel %vm1623_vm2, %v701_v30, %v705_v24  ;;  %v715_v44 = vrot.slane %v714_v31, 4  ;;  %v463_v46 = vshll.u32 %v377_v20, 16 }
  0x33   : > { %v580_v47 = vshrl.u32 %v1713_v28, 16  ;;  %915 = vrot.lane.b32.xlu0 %v1393_v29, %s1518_s25  ;;  %v446_v49 = vor.u32 %v445_v36, %v442_v32  ;;  %v451_v51 = vrot.slane %v449_v38, 5  ;;  %v456_v52 = vrot.slane %v454_v39, 4  ;;  %v1763_v38 = vld [vmem:[%s1585_s7 + $0x30] sm:$0xf] }
  0x34   : > { %v459_v53 = vrot.slane %v457_v41, 5  ;;  %943 = vrot.lane.b32.xlu1 %v1397_v10, %s1515_s18  ;;  %v720_v25 = vsel %vm1623_vm2, %v715_v44, %v719_v26  ;;  %v465_v55 = vrot.slane %v463_v46, 5  ;;  %v583_v57 = vshll.u32 %v1713_v28, 16  ;;  %v1475_v26 = vld [vmem:[%s1598_s13 + $0x20] ss:$8 sps:$4 sm:$0xff]  }
  0x35   : > { %v582_v56 = vrot.slane %v580_v47, 4  ;;  %v1405_v59 = vcombine.low %v706_v43, %v720_v25  ;;  %v447_v21 = vrot.slane %v446_v49, 4  ;;  %v594_v61 = vshrl.u32 %v1720_v42, 16  ;;  %v378_v43 = vld [vmem:[%s1585_s7 + $0x34] sm:$0x1] }
  0x36   : > { %v460_v60 = vor.u32 %v459_v53, %v456_v52  ;;  %v585_v63 = vrot.slane %v583_v57, 5  ;;  %v597_v0 = vshll.u32 %v1720_v42, 16  ;;  %v1386_v1 = vcombine.low %v1713_v28, %v1720_v42  ;;  %v1766_v42 = vld [vmem:[%s1585_s7 + $0x38] sm:$0xf] }
  0x37   : > { %v589_v2 = vshll.u32 %v519_v48, 16  ;;  %971 = vrot.lane.b32.xlu0 %v1472_v35, %s1514_s17  ;;  %v452_v4 = vsel %vm1623_vm2, %v447_v21, %v451_v51  ;;  %v596_v7 = vrot.slane %v594_v61, 4  ;;  %v603_v8 = vshll.u32 %v520_v54, 16  ;;  %v379_v51 = vld [vmem:[%s1585_s7 + $0x3c] sm:$0x1] }
  0x38   : > { %v461_v6 = vrot.slane %v460_v60, 4  ;;  %991 = vrot.lane.b32.xlu1 %v1405_v59, %s1516_s19  ;;  %v599_v9 = vrot.slane %v597_v0, 5  ;;  %v586_v10 = vor.u32 %v585_v63, %v582_v56  ;;  %v722_v12 = vshrl.u32 %v1733_v58, 16  ;;  %v1778_v56 = vld [vmem:[%s1580_s28 + $0x30] sm:$0xf] }
  0x39   : > { %v591_v11 = vrot.slane %v589_v2, 5  ;;  %v605_v16 = vrot.slane %v603_v8, 5  ;;  %v725_v17 = vshll.u32 %v1733_v58, 16  ;;  %v736_v18 = vshrl.u32 %v1737_v62, 16  ;;  %v1781_v57 = vld [vmem:[%s1580_s28 + $0x38] sm:$0xf] }
  0x3a   : > { %v466_v14 = vsel %vm1623_vm2, %v461_v6, %v465_v55  ;;  %v587_v22 = vrot.slane %v586_v10, 4  ;;  %v600_v23 = vor.u32 %v599_v9, %v596_v7  ;;  %v724_v24 = vrot.slane %v722_v12, 4 }
  0x3b   : > { %v1382_v20 = vcombine.low %v452_v4, %v466_v14  ;;  %821 = vrot.lane.b32.xlu0 %v1473_v3, %s1512_s15  ;;  %v727_v27 = vrot.slane %v725_v17, 5  ;;  %v738_v28 = vrot.slane %v736_v18, 4  ;;  %v739_v29 = vshll.u32 %v1737_v62, 16  ;;  %v522_v17 = vld [vmem:[%s1580_s28 + $0x3c] sm:$0x1] }
  0x3c   : > { %v1398_v30 = vcombine.low %v1733_v58, %v1737_v62  ;;  %v592_v31 = vsel %vm1623_vm2, %v587_v22, %v591_v11  ;;  %v601_v32 = vrot.slane %v600_v23, 4  ;;  %v731_v35 = vshll.u32 %v1368_v13, 16  ;;  %v521_v11 = vld [vmem:[%s1580_s28 + $0x34] sm:$0x1]  ;;  %v1354_v18 = vld [vmem:[%s1585_s7 + $0x38] sm:$0xf] }
  0x3d   : > { %841 = vrot.lane.b32.xlu1 %v1382_v20, %s1517_s20  ;;  %v745_v36 = vshll.u32 %v1369_v19, 16  ;;  %v741_v39 = vrot.slane %v739_v29, 5  ;;  %v728_v41 = vor.u32 %v727_v27, %v724_v24  ;;  %v468_v44 = vshrl.u32 %v1763_v38, 16  ;;  %v1478_v19 = vld [vmem:[%s1592_s10 + $0x30] ss:$8 sps:$4 sm:$0xff]   ;;  %s1346_s28 = sshll.u32 %s1918_s21, 1 }
  0x3e   : > { %v1373_v46 = vcombine.low %v1634_v45, %v1640_v50  ;;  %v606_v47 = vsel %vm1623_vm2, %v601_v32, %v605_v16  ;;  %v733_v48 = vrot.slane %v731_v35, 5  ;;  %v471_v52 = vshll.u32 %v1763_v38, 16  ;;  %v1355_v24 = vld [vmem:[%s1585_s7 + $0x40] sm:$0xf]  ;;  %s348_s9 = scalar_lea.vmem %s1910_s6, %s1346_s28 }
  0x3f   : > { %v747_v49 = vrot.slane %v745_v36, 5  ;;  %869 = vrot.lane.b32.xlu0 %v1386_v1, %s1511_s14  ;;  %v1394_v53 = vcombine.low %v592_v31, %v606_v47  ;;  %v729_v54 = vrot.slane %v728_v41, 4  ;;  %v742_v25 = vor.u32 %v741_v39, %v738_v28  ;;  %v1477_v1 = vld [vmem:[%s1592_s10 + $0x28] ss:$8 sps:$4 sm:$0xff]  }
  0x40   : > { %v470_v55 = vrot.slane %v468_v44, 4  ;;  %v473_v58 = vrot.slane %v471_v52, 5  ;;  %v477_v59 = vshll.u32 %v378_v43, 16  ;;  %v482_v21 = vshrl.u32 %v1766_v42, 16  ;;  %v1371_v52 = vld [vmem:[%s1585_s7 + $0x44] sm:$0x1] }
  0x41   : > { %897 = vrot.lane.b32.xlu1 %v1475_v26, %s1513_s16  ;;  %v485_v60 = vshll.u32 %v1766_v42, 16  ;;  %v734_v61 = vsel %vm1623_vm2, %v729_v54, %v733_v48  ;;  %v743_v62 = vrot.slane %v742_v25, 4  ;;  %v491_v63 = vshll.u32 %v379_v51, 16  ;;  %v1370_v51 = vld [vmem:[%s1585_s7 + $0x3c] sm:$0x1]  ;;  %s341_s7 = scalar_lea.vmem %s1909_s5, %s1346_s28 }
  0x42   : > { %v608_v0 = vshrl.u32 %v1778_v56, 16  ;;  %v474_v2 = vor.u32 %v473_v58, %v470_v55  ;;  %v479_v3 = vrot.slane %v477_v59, 5  ;;  %v484_v4 = vrot.slane %v482_v21, 4 }
  0x43   : > { %v487_v6 = vrot.slane %v485_v60, 5  ;;  %917 = vrot.lane.b32.xlu0 %v1394_v53, %s1518_s25  ;;  %v748_v7 = vsel %vm1623_vm2, %v743_v62, %v747_v49  ;;  %v493_v8 = vrot.slane %v491_v63, 5  ;;  %v611_v10 = vshll.u32 %v1778_v56, 16  ;;  %v1480_v60 = vld [vmem:[%s1598_s13 + $0x30] ss:$8 sps:$4 sm:$0xff]  }
  0x44   : > { %v610_v9 = vrot.slane %v608_v0, 4  ;;  %v1406_v12 = vcombine.low %v734_v61, %v748_v7  ;;  %v475_v13 = vrot.slane %v474_v2, 4  ;;  %v622_v16 = vshrl.u32 %v1781_v57, 16 }
  0x45   : > { %945 = vrot.lane.b32.xlu1 %v1398_v30, %s1515_s18  ;;  %v488_v14 = vor.u32 %v487_v6, %v484_v4  ;;  %v613_v20 = vrot.slane %v611_v10, 5  ;;  %v625_v22 = vshll.u32 %v1781_v57, 16  ;;  %v617_v23 = vshll.u32 %v521_v11, 16 }
  0x46   : > { %v480_v26 = vsel %vm1623_vm2, %v475_v13, %v479_v3  ;;  %v624_v28 = vrot.slane %v622_v16, 4  ;;  %v631_v29 = vshll.u32 %v522_v17, 16  ;;  %v750_v35 = vshrl.u32 %v1354_v18, 16 }
  0x47   : > { %v489_v27 = vrot.slane %v488_v14, 4  ;;  %973 = vrot.lane.b32.xlu0 %v1477_v1, %s1514_s17  ;;  %v627_v30 = vrot.slane %v625_v22, 5  ;;  %v614_v31 = vor.u32 %v613_v20, %v610_v9  ;;  %v619_v32 = vrot.slane %v617_v23, 5 }
  0x48   : > { %v633_v39 = vrot.slane %v631_v29, 5  ;;  %v753_v41 = vshll.u32 %v1354_v18, 16  ;;  %v764_v43 = vshrl.u32 %v1355_v24, 16  ;;  %v752_v49 = vrot.slane %v750_v35, 4 }
  0x49   : > { %993 = vrot.lane.b32.xlu1 %v1406_v12, %s1516_s19  ;;  %v494_v36 = vsel %vm1623_vm2, %v489_v27, %v493_v8  ;;  %v615_v47 = vrot.slane %v614_v31, 4  ;;  %v628_v48 = vor.u32 %v627_v30, %v624_v28  ;;  %v767_v25 = vshll.u32 %v1355_v24, 16  ;;  %v1482_v12 = vld [vmem:[%s1592_s10 + $0x38] ss:$8 sps:$4 sm:$0xff]  }
  0x4a   : > { %v1383_v44 = vcombine.low %v480_v26, %v494_v36  ;;  %v755_v53 = vrot.slane %v753_v41, 5  ;;  %v766_v54 = vrot.slane %v764_v43, 4  ;;  %v1387_v55 = vcombine.low %v1778_v56, %v1781_v57 }
  0x4b   : > { %823 = vrot.lane.b32.xlu0 %v1478_v19, %s1512_s15  ;;  %v629_v58 = vrot.slane %v628_v48, 4  ;;  %v759_v59 = vshll.u32 %v1370_v51, 16  ;;  %v773_v21 = vshll.u32 %v1371_v52, 16  ;;  %v620_v61 = vsel %vm1623_vm2, %v615_v47, %v619_v32 }
  0x4c   : > { %v769_v62 = vrot.slane %v767_v25, 5  ;;  %v756_v63 = vor.u32 %v755_v53, %v752_v49  ;;  %v1399_v57 = vcombine.low %v1354_v18, %v1355_v24  ;;  %v1519_v7 = vmov 0.0  }
  0x4d   : > { %843 = vrot.lane.b32.xlu1 %v1383_v44, %s1517_s20  ;;  %v634_v0 = vsel %vm1623_vm2, %v629_v58, %v633_v39  ;;  %v761_v1 = vrot.slane %v759_v59, 5  ;;  %v775_v4 = vrot.slane %v773_v21, 5  ;;  %1416 = vmatprep.subr.bf16.mxu0 %v1519_v7  ;;  %v1374_v8 = vcombine.low %v1693_v5, %v1701_v15 }
  0x4e   : > { %v757_v2 = vrot.slane %v756_v63, 4  ;;  %v770_v3 = vor.u32 %v769_v62, %v766_v54  ;;  %v1395_v56 = vcombine.low %v620_v61, %v634_v0  ;;  %v1375_v10 = vcombine.low %v1763_v38, %v1766_v42  ;;  %1424 = vmatprep.mubr.msk.bf16.mxu0 %vm1520_vm3, %v1519_v7 }
  0x4f   : > { %871 = vrot.lane.b32.xlu0 %v1387_v55, %s1511_s14 }
  0x50   : > { %v771_v6 = vrot.slane %v770_v3, 4  ;;  %v762_v9 = vsel %vm1623_vm2, %v757_v2, %v761_v1 }
  0x51   : > { %899 = vrot.lane.b32.xlu1 %v1480_v60, %s1513_s16 }
  0x52   : > { %v776_v11 = vsel %vm1623_vm2, %v771_v6, %v775_v4 }
  0x53   : > { %919 = vrot.lane.b32.xlu0 %v1395_v56, %s1518_s25  ;;  %v1407_v13 = vcombine.low %v762_v9, %v776_v11 }
  0x55   : > { %947 = vrot.lane.b32.xlu1 %v1399_v57, %s1515_s18 }
  0x57   : > { %975 = vrot.lane.b32.xlu0 %v1482_v12, %s1514_s17 }
  0x59   : > { %995 = vrot.lane.b32.xlu1 %v1407_v13, %s1516_s19 }
  0x87   : > { %v866_v5 = vpop.permute.xlu1 %865  ;;  %v818_v15 = vpop.permute.xlu0 %817 }
  0x88   : > { %v1000_v19 = vsel %vm997_vm4, %v1372_v40, %v818_v15 }
  0x8b   : > { %v894_v14 = vpop.permute.xlu1 %893  ;;  %v970_v16 = vpop.permute.xlu0 %969 }
  0x8f   : > { %v942_v17 = vpop.permute.xlu1 %941  ;;  %v820_v37 = vpop.permute.xlu0 %819 }
  0x90   : > { %v1003_v34 = vsel %vm997_vm4, %v1373_v46, %v820_v37 }
  0x94   : > { %v990_v18 = vpop.permute.xlu1 %989 }
  0x99   : > { %v838_v20 = vpop.permute.xlu0 %837 }
  0x9a   : > { %v1012_v22 = vsel %vm1010_vm5, %v1000_v19, %v838_v20 }
  0x9b   : > { %v1021_v23 = vsel %vm1019_vm6, %v1012_v22, %v866_v5 }
  0x9c   : > { %v1030_v24 = vsel %vm1028_vm7, %v1021_v23, %v894_v14 }
  0x9d   : > { %v914_v26 = vpop.permute.xlu0 %913 }
  0x9e   : > { %v840_v27 = vpop.permute.xlu1 %839  ;;  %v1039_v28 = vsel %vm1037_vm8, %v1030_v24, %v914_v26 }
  0x9f   : > { %v1048_v33 = vsel %vm1046_vm9, %v1039_v28, %v942_v17  ;;  %v1014_v29 = vsel %vm1010_vm5, %v1003_v34, %v840_v27  ;;  %v1073_v17 = vld [vmem:[%s1908_s4] sm:$0x3] }
  0xa0   : > { %v1057_v40 = vsel %vm1055_vm10, %v1048_v33, %v970_v16 }
  0xa1   : > { %v868_v30 = vpop.permute.xlu0 %867  ;;  %v1066_v31 = vsel %vm1064_vm11, %v1057_v40, %v990_v18 }
  0xa2   : > { %v1023_v32 = vsel %vm1019_vm6, %v1014_v29, %v868_v30  ;;  %v896_v35 = vpop.permute.xlu1 %895  ;;  %v1078_v36 = vsel %vm1074_vm12, %v1066_v31, 0 }
  0xa3   : > { %1417 = vmatpush3.bf16.xpose.msra.mxu0 %v1078_v36  ;;  %v1032_v39 = vsel %vm1028_vm7, %v1023_v32, %v896_v35 }
  0xa4   : > { %1418 = vmatprep.subr.bf16.mxu0 %v1519_v7 }
  0xa5   : > { %v916_v45 = vpop.permute.xlu0 %915 }
  0xa6   : > { %v1041_v50 = vsel %vm1037_vm8, %v1032_v39, %v916_v45  ;;  %v944_v46 = vpop.permute.xlu1 %943 }
  0xa7   : > { %v1050_v41 = vsel %vm1046_vm9, %v1041_v50, %v944_v46 }
  0xa9   : > { %v972_v43 = vpop.permute.xlu0 %971 }
  0xaa   : > { %v1059_v44 = vsel %vm1055_vm10, %v1050_v41, %v972_v43  ;;  %v992_v47 = vpop.permute.xlu1 %991 }
  0xab   : > { %v1068_v48 = vsel %vm1064_vm11, %v1059_v44, %v992_v47 }
  0xac   : > { %v1080_v49 = vsel %vm1074_vm12, %v1068_v48, 0 }
  0xad   : > { %1419 = vmatpush3.bf16.xpose.msra.mxu0 %v1080_v49  ;;  %v822_v51 = vpop.permute.xlu0 %821 }
  0xae   : > { %v1006_v52 = vsel %vm997_vm4, %v1374_v8, %v822_v51  ;;  %1420 = vmatprep.subr.bf16.mxu0 %v1519_v7 }
  0xaf   : > { %v842_v53 = vpop.permute.xlu1 %841 }
  0xb0   : > { %v1016_v54 = vsel %vm1010_vm5, %v1006_v52, %v842_v53 }
  0xb1   : > { %v870_v25 = vpop.permute.xlu0 %869 }
  0xb2   : > { %v1025_v55 = vsel %vm1019_vm6, %v1016_v54, %v870_v25 }
  0xb3   : > { %v898_v58 = vpop.permute.xlu1 %897 }
  0xb4   : > { %v1034_v59 = vsel %vm1028_vm7, %v1025_v55, %v898_v58 }
  0xb5   : > { %v918_v21 = vpop.permute.xlu0 %917 }
  0xb6   : > { %v1043_v60 = vsel %vm1037_vm8, %v1034_v59, %v918_v21 }
  0xb7   : > { %v946_v61 = vpop.permute.xlu1 %945 }
  0xb8   : > { %v1052_v62 = vsel %vm1046_vm9, %v1043_v60, %v946_v61 }
  0xb9   : > { %v974_v63 = vpop.permute.xlu0 %973 }
  0xba   : > { %v1061_v0 = vsel %vm1055_vm10, %v1052_v62, %v974_v63 }
  0xbb   : > { %v994_v1 = vpop.permute.xlu1 %993 }
  0xbc   : > { %v1070_v2 = vsel %vm1064_vm11, %v1061_v0, %v994_v1 }
  0xbd   : > { %v1082_v3 = vsel %vm1074_vm12, %v1070_v2, 0  ;;  %v824_v4 = vpop.permute.xlu0 %823 }
  0xbe   : > { %1421 = vmatpush3.bf16.xpose.msra.mxu0 %v1082_v3  ;;  %v1009_v56 = vsel %vm997_vm4, %v1375_v10, %v824_v4 }
  0xbf   : > { %v844_v57 = vpop.permute.xlu1 %843  ;;  %1422 = vmatprep.subr.bf16.mxu0 %v1519_v7 }
  0xc0   : > { %v1018_v6 = vsel %vm1010_vm5, %v1009_v56, %v844_v57 }
  0xc1   : > { %v872_v8 = vpop.permute.xlu0 %871 }
  0xc2   : > { %v1027_v9 = vsel %vm1019_vm6, %v1018_v6, %v872_v8 }
  0xc3   : > { %v900_v11 = vpop.permute.xlu1 %899 }
  0xc4   : > { %v1036_v12 = vsel %vm1028_vm7, %v1027_v9, %v900_v11 }
  0xc5   : > { %v920_v13 = vpop.permute.xlu0 %919 }
  0xc6   : > { %v1045_v5 = vsel %vm1037_vm8, %v1036_v12, %v920_v13 }
  0xc7   : > { %v948_v15 = vpop.permute.xlu1 %947 }
  0xc8   : > { %v1054_v38 = vsel %vm1046_vm9, %v1045_v5, %v948_v15 }
  0xc9   : > { %v976_v42 = vpop.permute.xlu0 %975 }
  0xca   : > { %v1063_v10 = vsel %vm1055_vm10, %v1054_v38, %v976_v42 }
  0xcb   : > { %v996_v14 = vpop.permute.xlu1 %995 }
  0xcc   : > { %v1072_v7 = vsel %vm1064_vm11, %v1063_v10, %v996_v14 }
  0xcd   : > { %v1084_v16 = vsel %vm1074_vm12, %v1072_v7, 0 }
  0xce   : > { %1423 = vmatpush3.bf16.xpose.msra.mxu0 %v1084_v16 }
  0xd5   : > { %1425 = vmatmul.mubr.msk.bf16.vlgmr.msra.gmra.mrb[0].mxu0 %vm1074_vm12, %v1073_v17 }
 0x1a8   : > { %v1120_v37 = vpop.f32.mrb[0].mxu0 }
 0x1a9   : > { %v1126_v18 = vpack.c.bf16 %v1120_v37, %v1120_v37  ;;  %v1426_v19 = vpop.f32.mrb[1].mxu0  ;;  %v1130_v20 = vsel %vm1129_vm13, %v1120_v37, 0.0  ;;  %v1133_v22 = vmul.f32 %v1120_v37, %v1120_v37 }
 0x1aa   : > { %1131 = vadd.xlane.f32.xlu0 %v1130_v20  ;;  %v1123_v23 = vpop.f32.mrb[2].mxu0 }
 0x1ab   : > { %v1427_v24 = vpop.f32.mrb[3].mxu0  ;;  %v1134_v26 = vsel %vm1129_vm13, %v1133_v22, 0.0  ;;  %1128 = vst.msk [vmem:[%s341_s7] sm:$0x3] %vm1127_vm14, %v1126_v18 }
 0x1ac   : > { %1135 = vadd.xlane.f32.xlu1 %v1134_v26 }
 0x237   : > { %v1132_v27 = vpop.xlane.xlu0 %1131 }
 0x239   : > { %v1136_v28 = vpop.xlane.xlu1 %1135 }
 0x23a   : > { %v1138_v33 = vsel %vm1137_vm15, %v1132_v27, %v1136_v28 }
 0x23b   : > { %1139 = vxpose.xlu0.b32.start.end [1/1] (short) (narrow) %v1138_v33, 8 }
 0x2bb   : > { %v1155_v34 = vpop.trf.xlu0 }
 0x2bc   : > { %1172 = vst.msk [vmem:[%s348_s9] sm:$0x3] %vm1171_vm0, %v1155_v34 }
 0x2bd PF: > { %s17_s23 = sadd.s32 1, %s1509_s23   ;;  %s1913_s21 = smov %s1505_s22 }
 0x2be   : > { %p14_p5 = scmp.ge.s32.totalorder %s17_s23, 4   ;;  %s1914_s22 = smov %s1916_s24 }
 0x2c0   :  { %16 = sbr.rel (!%p14_p5) target bundleno = 2 (0x2), region = 97 }

</bundles_post_ra>
